<compile_context>
chip_gen: v7x
topology: tpu7x:2x2x1
jax: 0.10.0
libtpu: 0.0.40
codegen_flags: <defaults>
</compile_context>

<pallas_src>
import functools

import jax
import jax.numpy as jnp
from jax.experimental import pallas as pl
from jax.experimental.pallas import tpu as pltpu


# ----------------------------- Pallas kernel ------------------------------ #
def _repadapter_kernel(router_ref, x_ref, wa_ref, ba_ref, wb_ref, bb_ref,
                       wd_ref, bd_ref, o_ref, *, compute_dtype):
    b = pl.program_id(0)
    # Per-batch router scalars (already multiplied by `scale` in the wrapper),
    # read from SMEM.
    r0 = router_ref[b, 0]
    r1 = router_ref[b, 1]

    x = x_ref[0]                                            # [tN, C] f32

    # ---- Stage 1: conv_A (1x1, groups=1) == per-token matmul C -> Hp ----
    h = (jnp.dot(x.astype(compute_dtype), wa_ref[...],
                 preferred_element_type=jnp.float32)
         + ba_ref[...])                                     # [tN, Hp] f32

    # ---- Stage 2: conv_B / conv_D fused into ONE matmul ----
    # out = (h@Wb + bb)*r0 + (h@Wd + bd)*r1 + x
    #     = h @ (r0*Wb + r1*Wd) + (r0*bb + r1*bd) + x
    # Combined weight is computed in f32 (tiny [Hp, C] axpy on the VPU) before
    # any low-precision cast, as required for accuracy.
    w_comb = (r0 * wb_ref[...].astype(jnp.float32)
              + r1 * wd_ref[...].astype(jnp.float32))       # [Hp, C] f32
    b_comb = r0 * bb_ref[...] + r1 * bd_ref[...]            # [1, C]  f32

    y = jnp.dot(h.astype(compute_dtype), w_comb.astype(compute_dtype),
                preferred_element_type=jnp.float32)         # [tN, C] f32

    o_ref[0] = (y + b_comb + x).astype(o_ref.dtype)


# ------------------------------- wrapper ----------------------------------- #
def repadapter_router(x, folded_params, *, scale=1.0, t=10.0, weights=None,
                      compute_dtype=jnp.float32, tn=None):
    """x: [B, N, C] float32. Returns [B, N, C] float32."""
    B, N, C = x.shape
    wa, ba, we, be, wb, bb, wd, bd = folded_params
    Hp = wa.shape[1]

    # ---- Router hoisted out of the kernel (tiny GEMV + 2-way softmax) ----
    if weights is None:
        weights = jax.nn.softmax((x[:, 0, :] @ we + be[0]) / t, axis=-1)  # [B,2]
    router = (scale * weights).astype(jnp.float32)          # fold `scale` in

    # Token tile.  At the test size (N=8) the whole sequence is one tile; at
    # real adapter sizes this gives M >= 256 rows per MXU push.
    if tn is None:
        tn = N if N <= 512 else 512
    assert N % tn == 0, "token tile must divide N"
    n_tiles = N // tn

    # Matmul operands in compute_dtype; biases / router / residual stay f32.
    wa_c = wa.astype(compute_dtype)
    wb_c = wb.astype(compute_dtype)
    wd_c = wd.astype(compute_dtype)

    smem_spec = pl.BlockSpec(memory_space=pltpu.MemorySpace.SMEM)
    full2d = lambda a: pl.BlockSpec(a.shape, lambda b, n: (0, 0))

    kernel = functools.partial(_repadapter_kernel, compute_dtype=compute_dtype)
    # NOTE: x/out tiles here are tiny; for large N*C (esp. v7x's 64 MiB VMEM)
    # shrink `tn` and/or raise vmem_limit_bytes explicitly.
    return pl.pallas_call(
        kernel,
        out_shape=jax.ShapeDtypeStruct((B, N, C), x.dtype),
        grid_spec=pltpu.PrefetchScalarGridSpec(
            num_scalar_prefetch=0,
            grid=(B, n_tiles),
            in_specs=[
                smem_spec,                                        # router [B,2]
                pl.BlockSpec((1, tn, C), lambda b, n: (b, n, 0)),  # x
                full2d(wa_c), full2d(ba),                         # conv_A
                full2d(wb_c), full2d(bb),                         # conv_B (blockdiag)
                full2d(wd_c), full2d(bd),                         # conv_D (blockdiag)
            ],
            out_specs=pl.BlockSpec((1, tn, C), lambda b, n: (b, n, 0)),
        ),
        compiler_params=pltpu.CompilerParams(
            dimension_semantics=("parallel", "parallel")),
    )(router, x, wa_c, ba, wb_c, bb, wd_c, bd)


# ------------------------- parameter construction ------------------------- #
def make_params(key, in_features, hidden_dim, groups, *, pad_h_to=128):
    """Deterministic synthetic parameters matching the PyTorch shapes.

    conv_A.weight: [H, C, 1], conv_B/D.weight: [C, H//g, 1] (grouped),
    expert_weights: Linear(C, 2).  Grouped conv weights are folded into
    block-diagonal [Hp, C] matrices (H zero-padded to Hp, a multiple of 128,
    for lane-dense intermediates) so the kernel does plain matmuls.
    NOTE: the PyTorch module zero-inits conv_B/conv_D; we use small random
    values instead so the kernel math is actually exercised.
    """
    C, H, g = in_features, hidden_dim, groups
    Cg, Hg = C // g, H // g
    Hp = ((H + pad_h_to - 1) // pad_h_to) * pad_h_to
    keys = jax.random.split(key, 8)

    bound_a = (6.0 / (C + H)) ** 0.5
    conv_a_w = jax.random.uniform(keys[0], (H, C, 1), jnp.float32,
                                  -bound_a, bound_a)
    conv_a_b = 0.01 * jax.random.normal(keys[1], (H,), jnp.float32)

    conv_b_w = 0.05 * jax.random.normal(keys[2], (C, Hg, 1), jnp.float32)
    conv_b_b = 0.01 * jax.random.normal(keys[3], (C,), jnp.float32)
    conv_d_w = 0.05 * jax.random.normal(keys[4], (C, Hg, 1), jnp.float32)
    conv_d_b = 0.01 * jax.random.normal(keys[5], (C,), jnp.float32)

    lin_w = 0.1 * jax.random.normal(keys[6], (2, C), jnp.float32)
    lin_b = 0.1 * jax.random.normal(keys[7], (2,), jnp.float32)

    # Fold into kernel-friendly matrices (H padded to Hp with zeros).
    wa = jnp.zeros((C, Hp), jnp.float32).at[:, :H].set(conv_a_w[:, :, 0].T)
    ba = jnp.zeros((1, Hp), jnp.float32).at[0, :H].set(conv_a_b)

    def blockdiag(conv_w):                          # [C, Hg, 1] -> [Hp, C]
        full = jnp.zeros((Hp, C), jnp.float32)
        for gi in range(g):
            blk = conv_w[gi * Cg:(gi + 1) * Cg, :, 0].T       # [Hg, Cg]
            full = full.at[gi * Hg:(gi + 1) * Hg,
                           gi * Cg:(gi + 1) * Cg].set(blk)
        return full

    wb, bb = blockdiag(conv_b_w), conv_b_b.reshape(1, C)
    wd, bd = blockdiag(conv_d_w), conv_d_b.reshape(1, C)
    we, be = lin_w.T, lin_b.reshape(1, 2)          # [C, 2], [1, 2]

    raw = (conv_a_w, conv_a_b, conv_b_w, conv_b_b,
           conv_d_w, conv_d_b, lin_w, lin_b)
    folded = (wa, ba, we, be, wb, bb, wd, bd)
    return raw, folded


# --------------------------- pure-JAX reference ---------------------------- #
def reference(x, raw, groups, scale, t):
    (conv_a_w, conv_a_b, conv_b_w, conv_b_b,
     conv_d_w, conv_d_b, lin_w, lin_b) = raw
    B, N, C = x.shape
    H = conv_a_w.shape[0]
    g, Cg, Hg = groups, C // groups, H // groups

    weights = jax.nn.softmax((x[:, 0] @ lin_w.T + lin_b) / t, axis=-1)  # [B,2]
    h = jnp.einsum("bnc,hc->bnh", x, conv_a_w[:, :, 0]) + conv_a_b      # [B,N,H]

    def grouped(conv_w, conv_b):
        outs = []
        for gi in range(g):
            w_g = conv_w[gi * Cg:(gi + 1) * Cg, :, 0]          # [Cg, Hg]
            h_g = h[:, :, gi * Hg:(gi + 1) * Hg]               # [B,N,Hg]
            outs.append(jnp.einsum("bnh,ch->bnc", h_g, w_g))
        return jnp.concatenate(outs, axis=-1) + conv_b

    yb, yd = grouped(conv_b_w, conv_b_b), grouped(conv_d_w, conv_d_b)
    return (yb * scale * weights[:, 0, None, None]
            + yd * scale * weights[:, 1, None, None] + x)


# ----------------------------------- main ---------------------------------- #
if __name__ == "__main__":
    B, N, C, H, G = 2, 8, 32, 8, 2
    SCALE, T = 1.0, 10.0

    key = jax.random.PRNGKey(0)
    kx, kp = jax.random.split(key)
    x = jax.random.normal(kx, (B, N, C), jnp.float32)
    raw, folded = make_params(kp, C, H, G)

    ref = reference(x, raw, G, SCALE, T)

    # f32 matmuls: exact match against the reference.
    out_f32 = repadapter_router(x, folded, scale=SCALE, t=T,
                                compute_dtype=jnp.float32)
    out_f32 = jax.block_until_ready(out_f32)
    assert out_f32.shape == (B, N, C)
    assert jnp.allclose(out_f32, ref, atol=1e-5, rtol=1e-5), (
        f"f32 max err {jnp.max(jnp.abs(out_f32 - ref))}")

    # bf16 matmul operands (f32 accumulation / residual): looser tolerance.
    out_bf16 = repadapter_router(x, folded, scale=SCALE, t=T,
                                 compute_dtype=jnp.bfloat16)
    out_bf16 = jax.block_until_ready(out_bf16)
    assert jnp.allclose(out_bf16, ref, atol=5e-2, rtol=5e-2), (
        f"bf16 max err {jnp.max(jnp.abs(out_bf16 - ref))}")

    print("KERNEL_OK")
</pallas_src>

<mosaic_0001>
module attributes {stable_mosaic.version = 11 : i64} {
  func.func @_repadapter_kernel(%arg0: i32, %arg1: i32, %arg2: memref<2x2xf32, #tpu.memory_space<smem>>, %arg3: memref<1x8x32xf32, #tpu.memory_space<vmem>>, %arg4: memref<32x128xf32, #tpu.memory_space<vmem>>, %arg5: memref<1x128xf32, #tpu.memory_space<vmem>>, %arg6: memref<128x32xf32, #tpu.memory_space<vmem>>, %arg7: memref<1x32xf32, #tpu.memory_space<vmem>>, %arg8: memref<128x32xf32, #tpu.memory_space<vmem>>, %arg9: memref<1x32xf32, #tpu.memory_space<vmem>>, %arg10: memref<1x8x32xf32, #tpu.memory_space<vmem>>) attributes {dimension_semantics = [#tpu.dimension_semantics<parallel>, #tpu.dimension_semantics<parallel>], iteration_bounds = array<i64: 2, 1>, scalar_prefetch = 0 : i64, scratch_operands = 0 : i64, tpu.core_type = #tpu.core_type<tc>, window_params = [{transform_indices = @transform_0, window_bounds = array<i64: 2, 2>}, {transform_indices = @transform_1, window_bounds = array<i64: 1, 8, 32>}, {pipeline_mode = #tpu.pipeline_mode<synchronous>, transform_indices = @transform_2, window_bounds = array<i64: 32, 128>}, {pipeline_mode = #tpu.pipeline_mode<synchronous>, transform_indices = @transform_3, window_bounds = array<i64: 1, 128>}, {pipeline_mode = #tpu.pipeline_mode<synchronous>, transform_indices = @transform_4, window_bounds = array<i64: 128, 32>}, {pipeline_mode = #tpu.pipeline_mode<synchronous>, transform_indices = @transform_5, window_bounds = array<i64: 1, 32>}, {pipeline_mode = #tpu.pipeline_mode<synchronous>, transform_indices = @transform_6, window_bounds = array<i64: 128, 32>}, {pipeline_mode = #tpu.pipeline_mode<synchronous>, transform_indices = @transform_7, window_bounds = array<i64: 1, 32>}, {transform_indices = @transform_8, window_bounds = array<i64: 1, 8, 32>}]} {
    %0 = arith.index_cast %arg0 : i32 to index
    %c0 = arith.constant 0 : index
    %1 = memref.load %arg2[%0, %c0] : memref<2x2xf32, #tpu.memory_space<smem>>
    %2 = arith.index_cast %arg0 : i32 to index
    %c1 = arith.constant 1 : index
    %3 = memref.load %arg2[%2, %c1] : memref<2x2xf32, #tpu.memory_space<smem>>
    %c0_0 = arith.constant 0 : index
    %c0_1 = arith.constant 0 : index
    %c0_2 = arith.constant 0 : index
    %4 = vector.load %arg3[%c0_0, %c0_1, %c0_2] : memref<1x8x32xf32, #tpu.memory_space<vmem>>, vector<1x8x32xf32>
    %5 = vector.shape_cast %4 : vector<1x8x32xf32> to vector<8x32xf32>
    %c0_3 = arith.constant 0 : index
    %c0_4 = arith.constant 0 : index
    %6 = vector.load %arg4[%c0_3, %c0_4] : memref<32x128xf32, #tpu.memory_space<vmem>>, vector<32x128xf32>
    %cst = arith.constant dense<0.000000e+00> : vector<8x128xf32>
    %7 = tpu.matmul %5, %6, %cst {dimension_numbers = #tpu.dot_dimension_numbers<[1], [0], [0], [1], [0, 0, 1, 1], [], []>} : vector<8x32xf32>, vector<32x128xf32>, vector<8x128xf32> -> vector<8x128xf32>
    %c0_5 = arith.constant 0 : index
    %c0_6 = arith.constant 0 : index
    %8 = vector.load %arg5[%c0_5, %c0_6] : memref<1x128xf32, #tpu.memory_space<vmem>>, vector<1x128xf32>
    %9 = vector.broadcast %8 : vector<1x128xf32> to vector<8x128xf32>
    %10 = arith.addf %7, %9 : vector<8x128xf32>
    %c0_7 = arith.constant 0 : index
    %c0_8 = arith.constant 0 : index
    %11 = vector.load %arg6[%c0_7, %c0_8] : memref<128x32xf32, #tpu.memory_space<vmem>>, vector<128x32xf32>
    %12 = vector.broadcast %1 : f32 to vector<128x32xf32>
    %13 = arith.mulf %12, %11 : vector<128x32xf32>
    %c0_9 = arith.constant 0 : index
    %c0_10 = arith.constant 0 : index
    %14 = vector.load %arg8[%c0_9, %c0_10] : memref<128x32xf32, #tpu.memory_space<vmem>>, vector<128x32xf32>
    %15 = vector.broadcast %3 : f32 to vector<128x32xf32>
    %16 = arith.mulf %15, %14 : vector<128x32xf32>
    %17 = arith.addf %13, %16 : vector<128x32xf32>
    %c0_11 = arith.constant 0 : index
    %c0_12 = arith.constant 0 : index
    %18 = vector.load %arg7[%c0_11, %c0_12] : memref<1x32xf32, #tpu.memory_space<vmem>>, vector<1x32xf32>
    %19 = vector.broadcast %1 : f32 to vector<1x32xf32>
    %20 = arith.mulf %19, %18 : vector<1x32xf32>
    %c0_13 = arith.constant 0 : index
    %c0_14 = arith.constant 0 : index
    %21 = vector.load %arg9[%c0_13, %c0_14] : memref<1x32xf32, #tpu.memory_space<vmem>>, vector<1x32xf32>
    %22 = vector.broadcast %3 : f32 to vector<1x32xf32>
    %23 = arith.mulf %22, %21 : vector<1x32xf32>
    %24 = arith.addf %20, %23 : vector<1x32xf32>
    %cst_15 = arith.constant dense<0.000000e+00> : vector<8x32xf32>
    %25 = tpu.matmul %10, %17, %cst_15 {dimension_numbers = #tpu.dot_dimension_numbers<[1], [0], [0], [1], [0, 0, 1, 1], [], []>} : vector<8x128xf32>, vector<128x32xf32>, vector<8x32xf32> -> vector<8x32xf32>
    %26 = vector.broadcast %24 : vector<1x32xf32> to vector<8x32xf32>
    %27 = arith.addf %25, %26 : vector<8x32xf32>
    %28 = arith.addf %27, %5 : vector<8x32xf32>
    %c0_16 = arith.constant 0 : index
    %c0_17 = arith.constant 0 : index
    %c0_18 = arith.constant 0 : index
    %29 = vector.load %arg10[%c0_16, %c0_17, %c0_18] : memref<1x8x32xf32, #tpu.memory_space<vmem>>, vector<1x8x32xf32>
    %30 = vector.shape_cast %29 : vector<1x8x32xf32> to vector<8x32xf32>
    %31 = vector.shape_cast %28 : vector<8x32xf32> to vector<1x8x32xf32>
    tpu.vector_store %arg10[%c0_16, %c0_17, %c0_18], %31 {strides = array<i32>} : memref<1x8x32xf32, #tpu.memory_space<vmem>>, vector<1x8x32xf32>,
    return
  }
  func.func @transform_0(%arg0: i32, %arg1: i32) -> (i32, i32) {
    %c0_i32 = arith.constant 0 : i32
    %c0_i32_0 = arith.constant 0 : i32
    %c0_i32_1 = arith.constant 0 : i32
    return %c0_i32, %c0_i32_0 : i32, i32
  }
  func.func @transform_1(%arg0: i32, %arg1: i32) -> (i32, i32, i32) {
    %c0_i32 = arith.constant 0 : i32
    %c0_i32_0 = arith.constant 0 : i32
    return %arg0, %arg1, %c0_i32 : i32, i32, i32
  }
  func.func @transform_2(%arg0: i32, %arg1: i32) -> (i32, i32) {
    %c0_i32 = arith.constant 0 : i32
    %c0_i32_0 = arith.constant 0 : i32
    %c0_i32_1 = arith.constant 0 : i32
    return %c0_i32, %c0_i32_0 : i32, i32
  }
  func.func @transform_3(%arg0: i32, %arg1: i32) -> (i32, i32) {
    %c0_i32 = arith.constant 0 : i32
    %c0_i32_0 = arith.constant 0 : i32
    %c0_i32_1 = arith.constant 0 : i32
    return %c0_i32, %c0_i32_0 : i32, i32
  }
  func.func @transform_4(%arg0: i32, %arg1: i32) -> (i32, i32) {
    %c0_i32 = arith.constant 0 : i32
    %c0_i32_0 = arith.constant 0 : i32
    %c0_i32_1 = arith.constant 0 : i32
    return %c0_i32, %c0_i32_0 : i32, i32
  }
  func.func @transform_5(%arg0: i32, %arg1: i32) -> (i32, i32) {
    %c0_i32 = arith.constant 0 : i32
    %c0_i32_0 = arith.constant 0 : i32
    %c0_i32_1 = arith.constant 0 : i32
    return %c0_i32, %c0_i32_0 : i32, i32
  }
  func.func @transform_6(%arg0: i32, %arg1: i32) -> (i32, i32) {
    %c0_i32 = arith.constant 0 : i32
    %c0_i32_0 = arith.constant 0 : i32
    %c0_i32_1 = arith.constant 0 : i32
    return %c0_i32, %c0_i32_0 : i32, i32
  }
  func.func @transform_7(%arg0: i32, %arg1: i32) -> (i32, i32) {
    %c0_i32 = arith.constant 0 : i32
    %c0_i32_0 = arith.constant 0 : i32
    %c0_i32_1 = arith.constant 0 : i32
    return %c0_i32, %c0_i32_0 : i32, i32
  }
  func.func @transform_8(%arg0: i32, %arg1: i32) -> (i32, i32, i32) {
    %c0_i32 = arith.constant 0 : i32
    %c0_i32_0 = arith.constant 0 : i32
    return %arg0, %arg1, %c0_i32 : i32, i32, i32
  }
}

</mosaic_0001>

<bundles_post_ra>
// kernel: tpu_custom_call.1
= control target key start
LH: loop header
LB: loop body
LE: loop exit
PB: predicated region body
PF: predicated region fallthrough
CT: control target
= control target key end

     0   :  { %s1334_s0 = inlined_call_operand.vmem [shape: f32[2,2], index: 0, kind: input, shape index: {}]   ;;  %s1335_s1 = inlined_call_operand.vmem [shape: f32[2,8,32], index: 1, kind: input, shape index: {}]   ;;  %s1336_s2 = inlined_call_operand.vmem [shape: f32[32,128], index: 2, kind: input, shape index: {}]   ;;  %s1337_s3 = inlined_call_operand.vmem [shape: f32[1,128], index: 3, kind: input, shape index: {}]   ;;  %s1338_s4 = inlined_call_operand.vmem [shape: f32[128,32], index: 4, kind: input, shape index: {}]   ;;  %s1339_s5 = inlined_call_operand.vmem [shape: f32[1,32], index: 5, kind: input, shape index: {}]   ;;  %s1340_s6 = inlined_call_operand.vmem [shape: f32[128,32], index: 6, kind: input, shape index: {}]   ;;  %s1341_s7 = inlined_call_operand.vmem [shape: f32[1,32], index: 7, kind: input, shape index: {}]   ;;  %s1342_s8 = inlined_call_operand.hbm [shape: f32[2,8,32], index: 8, kind: output, shape index: {}]  }
   0x1   :  { %1345 = sst [smem:[#allocation10_spill]] %s1334_s0 }
   0x2   :  { %1346 = sst [smem:[#allocation11_spill]] %s1336_s2 }
   0x3   :  { %13 = vsyncpa [#allocation4], 0 }
   0x4   :  { %14 = vsyncpa [#allocation3], 0 }
   0x5   :  { %16 = vsyncpa [#allocation3 + $0x1], 0  ;;  %s1025_s27 = smov 0   ;;  %s1027_s28 = smov 0  }
   0x6   :  { %s1029_s29 = smov 0   ;;  %s1031_s30 = smov 0  }
   0x7   :  { %s1033_s9 = smov 0   ;;  %s1035_s10 = smov 0  }
   0x8 LB: > { %1347 = sst [smem:[#allocation8_spill]] %s969_s9  ;;  %s693_s11 = sadd.s32 4294967295, %s973_s10   ;;  %s973_s10 = sphi %s1035_s10, %s22_s10   ;;  %s969_s9 = sphi %s1033_s9, %s1356_s9   ;;  %s965_s30 = sphi %s1031_s30, %s1355_s30   ;;  %s961_s29 = sphi %s1029_s29, %s1359_s29   ;;  %s957_s28 = sphi %s1027_s28, %s1358_s28   ;;  %s953_s27 = sphi %s1025_s27, %s1357_s27  }
   0x9   : > { %s694_s12 = sadd.s32 4294967294, %s973_s10   ;;  %s34_s13 = sadd.s32 1, %s969_s9 }
   0xa   : > { %s218_s14 = sadd.s32 1, %s961_s29  ;;  %p36_p0 = scmp.ge.s32.totalorder %s34_s13, 2 }
   0xb   : > { %p228_p1 = scmp.ne.s32.totalorder %s961_s29, %s957_s28  ;;  %p229_p2 = scmp.eq.s32.totalorder %s693_s11, 1 }
   0xc   : > { %p234_p3 = scmp.ne.s32.totalorder %s957_s28, %s953_s27  ;;  %s1361_s13 = smov (%p36_p0, %s34_s13), 0 }
   0xd   : > { %1348 = sst [smem:[#allocation9_spill]] %s1361_s13  ;;  %p1065_p4 = por %p229_p2, %p228_p1 }
   0xe   : > { %p235_p5 = scmp.eq.s32.totalorder %s694_s12, 1  ;;  %s213_s16 = ssub.s32 %s969_s9, %s1361_s13 }
   0xf   : > { %p695_p6 = scmp.ge.s32.totalorder %s973_s10, 1  ;;  %p216_p7 = scmp.eq.s32.totalorder %s213_s16, 0 }
  0x10   : > { %p1072_p8 = por %p235_p5, %p234_p3  ;;  %p242_p9 = scmp.lt.s32.totalorder %s973_s10, 3 }
  0x11   : > { %s1078_s18 = scalar_select %p216_p7, %s961_s29, %s218_s14  }
  0x12   : > { %p1080_p10 = pnand %p695_p6, %p242_p9  ;;  %p1084_p11 = scmp.eq.s32.totalorder %s693_s11, 0 }
  0x13   : > { %s1353_s0 = sld [smem:[#allocation10_spill]] }
  0x14   : > { %p813_p12 = pneg %p1080_p10 }
  0x16   : > { %p814_p13 = pnand %p1084_p11, %p813_p12 }
  0x18   : > { %p878_p1 = pneg %p814_p13 }
  0x19   : > { %s255_s23 = sshll.u32 %s1353_s0, 4  ;;  %s256_s23 = int_to_ptr.vmem [resolvable:$true] %s255_s23 }
  0x1a   : > { %s876_s24 = scalar_lea.vmem %s256_s23, 32  ;;  %p884_p5 = scmp.lt.s32.totalorder %s256_s23, %s256_s23 }
  0x1b   : > { %p877_p0 = scmp.ne.s32.totalorder %s256_s23, %s876_s24  ;;  %p885_p6 = scmp.lt.s32.totalorder %s876_s24, %s876_s24 }
  0x1d   : > { %p879_p2 = pnand %p878_p1, %p877_p0  ;;  %p886_p7 = por %p885_p6, %p884_p5 }
  0x1f   : > { %p880_p3 = pneg %p879_p2 }
  0x21   : > { %p887_p9 = pnand %p886_p7, %p880_p3 }
  0x23   : > { %890 = shalt.err (!%p887_p9)
}
  0x24   : > { %s975_s25 = smov [#allocation2]   ;;  %296 = sbr.rel (%p1080_p10) target bundleno = 506 (0x1fa), region = 52 }
  0x25   : > { %816 = dma.vmem_to_smem (!%p814_p13), %s256_s23, 32, %s975_s25, [#allocation4]  }
  0x2b   : > { %944 = dma.done.wait (%p1084_p11), [#allocation4], 32  }
  0x2c   : > { %946 = vsyncadd (%p1084_p11), [#allocation4], 4294967264 }
  0x2d   : > { %302 = sfence }
  0x2e   : > { %s1354_s2 = sld [smem:[#allocation11_spill]]  ;;  %v976_v3 = vmov 0.0|0.0   ;;  %vm977_vm0 = vmmov 0   ;;  %v978_v6 = vmov 0.0   ;;  %p333_p10 = scmp.lt.s32.totalorder %s965_s30, 1  ;;  %v430_v8 = vld [vmem:[%s1338_s4] sm:$0xff] }
  0x2f   : > { %777 = vmatprep.subr.bf16.mxu0 %v976_v3  ;;  %739 = vmatprep.mubr.msk.f32.mxu0 %vm977_vm0, %v978_v6  ;;  %s1116_s22 = sshll.u32 %s965_s30, 7  ;;  %v431_v9 = vld [vmem:[%s1338_s4 + $0x8] sm:$0xff]  ;;  %v432_v10 = vld [vmem:[%s1338_s4 + $0x10] sm:$0xff]  ;;  %v433_v11 = vld [vmem:[%s1338_s4 + $0x18] sm:$0xff]  ;;  %vm356_vm1 = vcmask 261120   ;;  %s330_s21 = sand.u32 1, %s957_s28  }
  0x30   : > { %783 = vmatprep.subr.bf16.mxu1 %v976_v3  ;;  %s341_s23 = sld [smem:[#allocation2 + %s1116_s22]]  ;;  %s342_s24 = sadd.s32 1, %s1116_s22  ;;  %774 = vmatprep.mubr.msk.f32.mxu1 %vm977_vm0, %v978_v6  ;;  %v463_v13 = vld [vmem:[%s1340_s6] sm:$0xff]  ;;  %v464_v14 = vld [vmem:[%s1340_s6 + $0x8] sm:$0xff]  ;;  %v465_v16 = vld [vmem:[%s1340_s6 + $0x10] sm:$0xff] }
  0x31   : > { %s1363_s30 = smov (!%p333_p10, %s965_s30), 1  ;;  %s343_s25 = sld [smem:[#allocation2 + %s342_s24]]  ;;  %v466_v17 = vld [vmem:[%s1340_s6 + $0x18] sm:$0xff]  ;;  %v434_v18 = vld [vmem:[%s1338_s4 + $0x20] sm:$0xff]  ;;  %v435_v23 = vld [vmem:[%s1338_s4 + $0x28] sm:$0xff] }
  0x32   : > { %s701_s26 = sshll.u32 %s1363_s30, 3  ;;  %v467_v24 = vld [vmem:[%s1340_s6 + $0x20] sm:$0xff]  ;;  %v468_v25 = vld [vmem:[%s1340_s6 + $0x28] sm:$0xff]  ;;  %v436_v39 = vld [vmem:[%s1338_s4 + $0x30] sm:$0xff]  ;;  %s700_s30 = sshll.u32 %s330_s21, 3 }
  0x33   : > { %s339_s19 = scalar_lea.vmem %s1335_s1, %s701_s26  ;;  %v437_v40 = vld [vmem:[%s1338_s4 + $0x38] sm:$0xff]  ;;  %v469_v41 = vld [vmem:[%s1340_s6 + $0x30] sm:$0xff]  ;;  %v438_v51 = vld [vmem:[%s1338_s4 + $0x40] sm:$0xff]  ;;  %s1286_s0 = scalar_lea.hbm %s1342_s8, %s1116_s22 }
  0x34   : > { %v345_v0 = vld [vmem:[%s1354_s2] sm:$0xff]  ;;  %v346_v1 = vld [vmem:[%s1354_s2 + $0x8] sm:$0xff]  ;;  %v347_v2 = vld [vmem:[%s1354_s2 + $0x10] sm:$0xff]  ;;  %s979_s13 = smov [#allocation5]  }
  0x35   : > { %v778_v4 = vpack.c.bf16 %v346_v1, %v345_v0  ;;  %v348_v5 = vld [vmem:[%s1354_s2 + $0x18] sm:$0xff]  ;;  %v1138_v12 = vld [vmem:[%s339_s19] sm:$0xff]  ;;  %v439_v52 = vld [vmem:[%s1338_s4 + $0x48] sm:$0xff]  ;;  %s596_s2 = scalar_lea.sflag [#allocation3], %s330_s21  ;;  %s895_s12 = sshll.u32 %s979_s13, 4  ;;  %s896_s12 = int_to_ptr.vmem [resolvable:$false] %s895_s12 }
  0x36   : > { %v781_v7 = vpack.c.bf16 %v348_v5, %v347_v2  ;;  %v1146_v15 = vstv %s341_s23  ;;  %v470_v42 = vld [vmem:[%s1340_s6 + $0x38] sm:$0xff]  ;;  %v471_v53 = vld [vmem:[%s1340_s6 + $0x40] sm:$0xff]  ;;  %v472_v54 = vld [vmem:[%s1340_s6 + $0x48] sm:$0xff]  ;;  %s897_s14 = scalar_lea.vmem %s896_s12, 256 }
  0x37   : > { %779 = vmatpush3.bf16.msra.mxu0 %v778_v4  ;;  %v447_v19 = vmul.f32 %v1146_v15, %v430_v8  ;;  %v448_v20 = vmul.f32 %v1146_v15, %v431_v9  ;;  %v449_v21 = vmul.f32 %v1146_v15, %v432_v10  ;;  %v450_v22 = vmul.f32 %v1146_v15, %v433_v11  ;;  %v440_v58 = vld [vmem:[%s1338_s4 + $0x50] sm:$0xff]  ;;  %v441_v63 = vld [vmem:[%s1338_s4 + $0x58] sm:$0xff]  ;;  %v442_v10 = vld [vmem:[%s1338_s4 + $0x60] sm:$0xff] }
  0x38   : > { %780 = vmatprep.subr.bf16.mxu0 %v976_v3  ;;  %v1172_v26 = vstv %s343_s25  ;;  %v451_v31 = vmul.f32 %v1146_v15, %v434_v18  ;;  %v452_v32 = vmul.f32 %v1146_v15, %v435_v23  ;;  %v453_v44 = vmul.f32 %v1146_v15, %v436_v39  ;;  %v473_v0 = vld [vmem:[%s1340_s6 + $0x50] sm:$0xff]  ;;  %v474_v1 = vld [vmem:[%s1340_s6 + $0x58] sm:$0xff]  ;;  %v443_v11 = vld [vmem:[%s1338_s4 + $0x68] sm:$0xff]  ;;  %s332_s25 = scalar_lea.vmem [#allocation5], %s700_s30 }
  0x39   : > { %v480_v27 = vmul.f32 %v1172_v26, %v463_v13  ;;  %v481_v28 = vmul.f32 %v1172_v26, %v464_v14  ;;  %v482_v29 = vmul.f32 %v1172_v26, %v465_v16  ;;  %v483_v30 = vmul.f32 %v1172_v26, %v466_v17  ;;  %v475_v13 = vld [vmem:[%s1340_s6 + $0x60] sm:$0xff]  ;;  %v476_v14 = vld [vmem:[%s1340_s6 + $0x68] sm:$0xff]  ;;  %s610_s24 = sshll.u32 %s332_s25, 4  ;;  %s1288_s24 = int_to_ptr.vmem [resolvable:$true] %s610_s24 }
  0x3a   : > { %v484_v33 = vmul.f32 %v1172_v26, %v467_v24  ;;  %v485_v34 = vmul.f32 %v1172_v26, %v468_v25  ;;  %v454_v45 = vmul.f32 %v1146_v15, %v437_v40  ;;  %v486_v46 = vmul.f32 %v1172_v26, %v469_v41  ;;  %s891_s9 = scalar_lea.vmem %s1288_s24, 128  ;;  %p898_p0 = scmp.lt.s32.totalorder %s1288_s24, %s896_s12 }
  0x3b   : > { %782 = vmatpush3.bf16.msra.mxu0 %v781_v7  ;;  %v496_v35 = vadd.f32 %v480_v27, %v447_v19  ;;  %v497_v36 = vadd.f32 %v481_v28, %v448_v20  ;;  %v498_v37 = vadd.f32 %v482_v29, %v449_v21  ;;  %v499_v38 = vadd.f32 %v483_v30, %v450_v22  ;;  %v444_v28 = vld [vmem:[%s1338_s4 + $0x70] sm:$0xff]  ;;  %v445_v29 = vld [vmem:[%s1338_s4 + $0x78] sm:$0xff]  ;;  %p892_p11 = scmp.ne.s32.totalorder %s1288_s24, %s891_s9  ;;  %p899_p1 = scmp.lt.s32.totalorder %s897_s14, %s891_s9 }
  0x3c   : > { %v500_v48 = vadd.f32 %v484_v33, %v451_v31  ;;  %v501_v49 = vadd.f32 %v485_v34, %v452_v32  ;;  %v487_v50 = vmul.f32 %v1172_v26, %v470_v42  ;;  %v502_v55 = vadd.f32 %v486_v46, %v453_v44  ;;  %v477_v30 = vld [vmem:[%s1340_s6 + $0x70] sm:$0xff]  ;;  %v514_v44 = vld [vmem:[%s1341_s7] sm:$0x1] }
  0x3d   : > { %v784_v43 = vpack.c.bf16 %v497_v36, %v496_v35  ;;  %v787_v47 = vpack.c.bf16 %v499_v38, %v498_v37  ;;  %v455_v56 = vmul.f32 %v1146_v15, %v438_v51  ;;  %v456_v57 = vmul.f32 %v1146_v15, %v439_v52  ;;  %v703_v38 = vld [vmem:[%s1337_s3] ss:$0 sm:$0xff]  ;;  %p893_p12 = pnand %p892_p11, %p1065_p4  ;;  %p900_p2 = por %p899_p1, %p898_p0 }
  0x3e   : > { %740 = vmatmul.mubr.msk.f32.vlgmr.msra.gmra.mrb[0].mxu0 %vm356_vm1, %v1138_v12  ;;  %v790_v59 = vpack.c.bf16 %v501_v49, %v500_v48  ;;  %v503_v60 = vadd.f32 %v487_v50, %v454_v45  ;;  %v488_v61 = vmul.f32 %v1172_v26, %v471_v53  ;;  %v489_v62 = vmul.f32 %v1172_v26, %v472_v54 }
  0x3f   : > { %785 = vmatpush3.bf16.msra.mxu1 %v784_v43  ;;  %v457_v2 = vmul.f32 %v1146_v15, %v440_v58  ;;  %v458_v4 = vmul.f32 %v1146_v15, %v441_v63  ;;  %v490_v5 = vmul.f32 %v1172_v26, %v473_v0  ;;  %v491_v6 = vmul.f32 %v1172_v26, %v474_v1  ;;  %v512_v43 = vld [vmem:[%s1339_s5] sm:$0x1]  ;;  %p894_p13 = pneg %p893_p12 }
  0x40   : > { %786 = vmatprep.subr.bf16.mxu1 %v976_v3  ;;  %v793_v7 = vpack.c.bf16 %v503_v60, %v502_v55  ;;  %v504_v8 = vadd.f32 %v488_v61, %v455_v56  ;;  %v505_v9 = vadd.f32 %v489_v62, %v456_v57  ;;  %v459_v18 = vmul.f32 %v1146_v15, %v442_v10 }
  0x41   : > { %v506_v16 = vadd.f32 %v490_v5, %v457_v2  ;;  %v507_v17 = vadd.f32 %v491_v6, %v458_v4  ;;  %v460_v20 = vmul.f32 %v1146_v15, %v443_v11  ;;  %v492_v21 = vmul.f32 %v1172_v26, %v475_v13  ;;  %p901_p3 = pnand %p900_p2, %p894_p13 }
  0x42   : > { %v796_v19 = vpack.c.bf16 %v505_v9, %v504_v8  ;;  %v493_v22 = vmul.f32 %v1172_v26, %v476_v14  ;;  %v461_v31 = vmul.f32 %v1146_v15, %v444_v28  ;;  %v462_v32 = vmul.f32 %v1146_v15, %v445_v29 }
  0x43   : > { %788 = vmatpush3.bf16.msra.mxu1 %v787_v47  ;;  %v799_v23 = vpack.c.bf16 %v507_v17, %v506_v16  ;;  %v508_v24 = vadd.f32 %v492_v21, %v459_v18  ;;  %v494_v33 = vmul.f32 %v1172_v26, %v477_v30  ;;  %v518_v42 = vlaneseq }
  0x44   : > { %789 = vmatprep.subr.bf16.mxu1 %v976_v3  ;;  %v509_v25 = vadd.f32 %v493_v22, %v460_v20  ;;  %v513_v45 = vmul.f32 %v512_v43, %v1146_v15  ;;  %v515_v46 = vmul.f32 %v514_v44, %v1172_v26 }
  0x45   : > { %v510_v35 = vadd.f32 %v494_v33, %v461_v31  ;;  %v519_v47 = vshrl.u32 %v518_v42, 7 }
  0x46   : > { %v802_v27 = vpack.c.bf16 %v509_v25, %v508_v24  ;;  %v516_v48 = vadd.f32 %v515_v46, %v513_v45 }
  0x47   : > { %791 = vmatpush3.bf16.msra.mxu1 %v790_v59  ;;  %v520_v49 = vsub.s32 0, %v519_v47 }
  0x48   : > { %792 = vmatprep.subr.bf16.mxu1 %v976_v3 }
  0x49   : > { %v521_v50 = vrot.slane %v516_v48, %v520_v49 }
  0x4b   : > { %794 = vmatpush3.bf16.msra.mxu1 %v793_v7 }
  0x4c   : > { %795 = vmatprep.subr.bf16.mxu1 %v976_v3 }
  0x4f   : > { %797 = vmatpush3.bf16.msra.mxu1 %v796_v19 }
  0x50   : > { %798 = vmatprep.subr.bf16.mxu1 %v976_v3 }
  0x53   : > { %800 = vmatpush3.bf16.msra.mxu1 %v799_v23 }
  0x54   : > { %801 = vmatprep.subr.bf16.mxu1 %v976_v3 }
  0x57   : > { %803 = vmatpush3.bf16.msra.mxu1 %v802_v27 }
  0x58   : > { %804 = vmatprep.subr.bf16.mxu1 %v976_v3  ;;  %v478_v3 = vld [vmem:[%s1340_s6 + $0x78] sm:$0xff] }
  0x59   : > { %v495_v34 = vmul.f32 %v1172_v26, %v478_v3 }
  0x5b   : > { %v511_v36 = vadd.f32 %v495_v34, %v462_v32 }
  0x5d   : > { %v805_v37 = vpack.c.bf16 %v511_v36, %v510_v35 }
  0x5f   : > { %806 = vmatpush3.bf16.msra.mxu1 %v805_v37 }
 0x111   : > { %v426_v39 = vpop.f32.mrb[0].mxu0 }
 0x112   : > { %v427_v40 = vadd.f32 %v703_v38, %v426_v39  ;;  %v741_v41 = vpop.f32.mrb[1].mxu0 }
 0x114   : > { %775 = vmatmul.mubr.f32.vlgmr.msra.gmra.mrb[0].mxu1 %v427_v40 }
 0x1e7   : > { %v589_v51 = vpop.f32.mrb[0].mxu1 }
 0x1e8   : > { %v590_v52 = vadd.f32 %v589_v51, %v521_v50  ;;  %v776_v53 = vpop.f32.mrb[1].mxu1 }
 0x1ea   : > { %v593_v54 = vadd.f32 %v590_v52, %v1138_v12 }
 0x1ec   : > { %594 = vst.msk [vmem:[%s332_s25] sm:$0xff] %vm356_vm1, %v593_v54 }
 0x1ed   : > { %904 = shalt.err (!%p901_p3)
}
 0x1ee   : > { %s905_s22 = scalar_lea.hbm %s1286_s0, 128  ;;  %s909_s19 = scalar_lea.hbm %s1342_s8, 256 }
 0x1ef   : > { %p906_p5 = scmp.ne.s32.totalorder %s1286_s0, %s905_s22  ;;  %p910_p9 = scmp.lt.u32.totalorder %s1286_s0, %s1342_s8 }
 0x1f0   : > { %p911_p10 = scmp.lt.u32.totalorder %s909_s19, %s905_s22  ;;  %p913_p12 = scmp.lt.u32.totalorder %s905_s22, %s1286_s0 }
 0x1f1   : > { %p907_p6 = pnand %p906_p5, %p1065_p4 }
 0x1f2   : > { %p912_p11 = por %p911_p10, %p910_p9 }
 0x1f3   : > { %p908_p7 = pneg %p907_p6 }
 0x1f4   : > { %p914_p13 = por %p913_p12, %p912_p11 }
 0x1f6   : > { %p915_p0 = pnand %p914_p13, %p908_p7 }
 0x1f8   : > { %918 = shalt.err (!%p915_p0)
}
 0x1f9   : > { %811 = dma.vmem_to_hbm [thread:$0]  (%p1065_p4), %s1288_s24, 128, %s1286_s0, %s596_s2  }
 0x1fa PF: > { %p823_p1 = scmp.ge.s32.totalorder %s973_s10, 2  ;;  %s622_s30 = sand.u32 1, %s953_s27  }
 0x1fb   : > { %s623_s25 = scalar_lea.sflag [#allocation3], %s622_s30 }
 0x1fc   : > { %p818_p2 = pnand %p823_p1, %p1072_p8 }
 0x1fe   : > { %948 = dma.done.wait (!%p818_p2), %s623_s25, 128  }
 0x1ff   : > { %950 = vsyncadd (!%p818_p2), %s623_s25, 4294967168  ;;  %s22_s10 = sadd.s32 1, %s973_s10   ;;  %s1355_s30 = sld [smem:[#allocation8_spill]] }
 0x200   : > { %p19_p3 = scmp.ge.s32.totalorder %s22_s10, 4   ;;  %s1356_s9 = sld [smem:[#allocation9_spill]] }
 0x201   : > { %s1357_s27 = smov %s957_s28  ;;  %s1358_s28 = smov %s961_s29 }
 0x202   : > { %s1359_s29 = smov %s1078_s18  ;;  %21 = sbr.rel (!%p19_p3) target bundleno = 8 (0x8), region = 92 }
 0x209   :  { %628 = vsyncpa [#allocation3], 1 }
 0x20a   :  { %630 = vsyncpa [#allocation3 + $0x1], 1 }
 0x20b   :  { %631 = vsyncpa [#allocation4], 1 }
 0x20c   :  { %633 = vsyncpa [#allocation4 + $0x1], 1 }

</bundles_post_ra>
